<compile_context>
chip_gen: v6e
topology: v6e:2x2x1
jax: 0.10.0
libtpu: 0.0.40
codegen_flags: <defaults>
</compile_context>

<pallas_src>
import functools

import jax
import jax.numpy as jnp
from jax.experimental import pallas as pl
from jax.experimental.pallas import tpu as pltpu

EPS = 1e-5
NEG_SLOPE = 0.2
LANE = 128


def _leaky_relu(x):
    # max-form: one vmul + vmax instead of compare+select (valid for 0<slope<1).
    return jnp.maximum(x, NEG_SLOPE * x)


def _bn_train(h, gamma, beta):
    # BatchNorm1d training-mode forward, refactored to per-feature scale/shift:
    # per-element apply is h*scale + shift (2 VPU ops).  rsqrt -> EUP.
    mean = jnp.mean(h, axis=0, keepdims=True)
    var = jnp.maximum(jnp.mean(h * h, axis=0, keepdims=True) - mean * mean, 0.0)
    scale = gamma * jax.lax.rsqrt(var + EPS)
    shift = beta - mean * scale
    return h * scale + shift


def resblock_kernel(nn_p, fout_p,
                    x_ref,        # (B, Fin)            f32
                    wa_ref,       # (Fin, nn_p+fout_p)  bf16  [fc1 | fc3]
                    w2_ref,       # (nn_p, fout_p)      bf16
                    vec_ref,      # (1, T)              f32   packed small vectors
                    out_ref):     # (B, fout_p)         bf16
    f32 = jnp.float32
    na = nn_p + fout_p

    # Static, 128-aligned views of the packed vector buffer (free).
    ba = vec_ref[:, 0:na]                                   # [b1 | b3]
    g1 = vec_ref[:, na:na + nn_p]
    be1 = vec_ref[:, na + nn_p:na + 2 * nn_p]
    off = na + 2 * nn_p
    b2 = vec_ref[:, off:off + fout_p]
    g2 = vec_ref[:, off + fout_p:off + 2 * fout_p]
    be2 = vec_ref[:, off + 2 * fout_p:off + 3 * fout_p]

    # In-kernel bf16 cast of x (hides under DMA/MXU); one fused MXU pass for
    # both matmuls that consume x:  x @ [w1 | w3], f32 accumulation.
    x = x_ref[...].astype(jnp.bfloat16)
    z = jnp.dot(x, wa_ref[...], preferred_element_type=f32) + ba
    h = z[:, :nn_p]                    # fc1 output   (nn_p is a 128-multiple)
    xin = _leaky_relu(z[:, nn_p:])     # shortcut: LeakyReLU(fc3(x))

    # Main branch: bn1 -> LeakyReLU -> fc2 -> bn2 (elementwise math in f32).
    h = _leaky_relu(_bn_train(h, g1, be1))
    h2 = jnp.dot(h.astype(jnp.bfloat16), w2_ref[...],
                 preferred_element_type=f32) + b2
    h2 = _bn_train(h2, g2, be2)

    # Residual add + final LeakyReLU; lane-dense bf16 store (fout_p 128-mult).
    out_ref[...] = _leaky_relu(xin + h2).astype(out_ref.dtype)


def _round_up(n, m):
    return (n + m - 1) // m * m


def prepare_resblock_params(p, Fin, Fout, n_neurons):
    """One-time (init-time) layout prep: pad, fuse, pack, cast.

    Zero/one padding is exact: padded fc1/fc3 output columns stay exactly 0
    through BN (gamma=1, beta=0), LeakyReLU, fc2 (zero rows/cols) and the
    residual, and are sliced off after the call.
    """
    nn_p = _round_up(n_neurons, LANE)
    fout_p = _round_up(Fout, LANE)
    f32, bf16 = jnp.float32, jnp.bfloat16

    dn, df = nn_p - n_neurons, fout_p - Fout

    w1 = jnp.pad(p["w1"], ((0, 0), (0, dn)))
    w3 = jnp.pad(p["w3"], ((0, 0), (0, df)))
    wa = jnp.concatenate([w1, w3], axis=1).astype(bf16)          # (Fin, nn_p+fout_p)
    w2 = jnp.pad(p["w2"], ((0, dn), (0, df))).astype(bf16)       # (nn_p, fout_p)

    vecs = jnp.concatenate(
        [jnp.pad(p["b1"], ((0, 0), (0, dn))),
         jnp.pad(p["b3"], ((0, 0), (0, df))),
         jnp.pad(p["g1"], ((0, 0), (0, dn)), constant_values=1.0),
         jnp.pad(p["be1"], ((0, 0), (0, dn))),
         jnp.pad(p["b2"], ((0, 0), (0, df))),
         jnp.pad(p["g2"], ((0, 0), (0, df)), constant_values=1.0),
         jnp.pad(p["be2"], ((0, 0), (0, df)))],
        axis=1).astype(f32)                                      # (1, 3*nn_p+4*fout_p)

    return {"wa": wa, "w2": w2, "vecs": vecs,
            "nn_p": nn_p, "fout_p": fout_p, "Fout": Fout, "Fin": Fin}


def resblock_forward(x, prep):
    """x: (B, Fin) float32.  `prep` comes from prepare_resblock_params (init-time)."""
    B, Fin = x.shape
    assert Fin == prep["Fin"]
    nn_p, fout_p, Fout = prep["nn_p"], prep["fout_p"], prep["Fout"]

    args = (x, prep["wa"], prep["w2"], prep["vecs"])

    def full(a):
        return pl.BlockSpec(a.shape, lambda: (0,) * a.ndim)

    # VMEM budget from actual operand/result bytes; no 2x double-buffer factor
    # (grid=() has no pipelining), clamped to 75% of this chip's VMEM capacity
    # (v7x: 64 MiB physical; v5e/v6e: 128 MiB).
    op_bytes = sum(a.size * a.dtype.itemsize for a in args) + B * fout_p * 2
    try:
        cap = pltpu.get_tpu_info().vmem_capacity_bytes
    except Exception:  # pragma: no cover - conservative fallback
        cap = 64 << 20
    vmem_bytes = int(min(op_bytes + (8 << 20), (cap * 3) // 4))

    out = pl.pallas_call(
        functools.partial(resblock_kernel, nn_p, fout_p),
        out_shape=jax.ShapeDtypeStruct((B, fout_p), jnp.bfloat16),
        grid=(),
        in_specs=[full(a) for a in args],
        out_specs=pl.BlockSpec((B, fout_p), lambda: (0, 0)),
        compiler_params=pltpu.CompilerParams(vmem_limit_bytes=vmem_bytes),
    )(*args)

    return out[:, :Fout]


def make_params(key, Fin, Fout, n_neurons):
    ks = jax.random.split(key, 10)
    s1 = 1.0 / jnp.sqrt(Fin)
    s2 = 1.0 / jnp.sqrt(n_neurons)
    return {
        # Linear weights stored as [in, out] (transposed vs PyTorch's [out, in]).
        "w1": jax.random.uniform(ks[0], (Fin, n_neurons), jnp.float32, -s1, s1),
        "b1": jax.random.uniform(ks[1], (1, n_neurons), jnp.float32, -s1, s1),
        "g1": 1.0 + 0.1 * jax.random.normal(ks[2], (1, n_neurons), jnp.float32),
        "be1": 0.1 * jax.random.normal(ks[3], (1, n_neurons), jnp.float32),
        "w2": jax.random.uniform(ks[4], (n_neurons, Fout), jnp.float32, -s2, s2),
        "b2": jax.random.uniform(ks[5], (1, Fout), jnp.float32, -s2, s2),
        "g2": 1.0 + 0.1 * jax.random.normal(ks[6], (1, Fout), jnp.float32),
        "be2": 0.1 * jax.random.normal(ks[7], (1, Fout), jnp.float32),
        "w3": jax.random.uniform(ks[8], (Fin, Fout), jnp.float32, -s1, s1),
        "b3": jax.random.uniform(ks[9], (1, Fout), jnp.float32, -s1, s1),
    }


def resblock_reference(x, p):
    # Pure-JAX f32 reference mirroring the PyTorch forward (training-mode BN).
    def bn(h, g, b):
        mean = jnp.mean(h, axis=0, keepdims=True)
        var = jnp.mean((h - mean) ** 2, axis=0, keepdims=True)
        return (h - mean) * jax.lax.rsqrt(var + EPS) * g + b

    xin = _leaky_relu(x @ p["w3"] + p["b3"])
    h = bn(x @ p["w1"] + p["b1"], p["g1"], p["be1"])
    h = _leaky_relu(h)
    h = bn(h @ p["w2"] + p["b2"], p["g2"], p["be2"])
    return _leaky_relu(xin + h)


if __name__ == "__main__":
    # B=16 fills the bf16 sublane packing; BN is over the full batch in-block.
    B, Fin, Fout, n_neurons = 16, 32, 64, 256

    key = jax.random.PRNGKey(0)
    kx, kp = jax.random.split(key)
    x = jax.random.normal(kx, (B, Fin), jnp.float32)
    params = make_params(kp, Fin, Fout, n_neurons)

    # One-time layout prep (not part of the per-forward cost).
    prep = jax.tree_util.tree_map(
        lambda a: jax.block_until_ready(a) if isinstance(a, jax.Array) else a,
        prepare_resblock_params(params, Fin, Fout, n_neurons))

    out = jax.block_until_ready(resblock_forward(x, prep))
    ref = resblock_reference(x, params)

    assert out.shape == (B, Fout)
    # bf16 MXU inputs / bf16 output with f32 accumulation -> small drift vs f32 ref.
    assert jnp.allclose(out.astype(jnp.float32), ref, atol=5e-2, rtol=5e-2), \
        "mismatch vs reference"

    print("KERNEL_OK")
</pallas_src>

<mosaic_0001>
module attributes {stable_mosaic.version = 11 : i64} {
  func.func @resblock_kernel(%arg0: memref<16x32xf32, #tpu.memory_space<vmem>>, %arg1: memref<32x384xbf16, #tpu.memory_space<vmem>>, %arg2: memref<256x128xbf16, #tpu.memory_space<vmem>>, %arg3: memref<1x1280xf32, #tpu.memory_space<vmem>>, %arg4: memref<16x128xbf16, #tpu.memory_space<vmem>>) attributes {dimension_semantics = [], scalar_prefetch = 0 : i64, scratch_operands = 0 : i64, tpu.core_type = #tpu.core_type<tc>} {
    %c0 = arith.constant 0 : index
    %c0_0 = arith.constant 0 : index
    %0 = vector.load %arg3[%c0, %c0_0] : memref<1x1280xf32, #tpu.memory_space<vmem>>, vector<1x384xf32>
    %c0_1 = arith.constant 0 : index
    %c384 = arith.constant 384 : index
    %1 = vector.load %arg3[%c0_1, %c384] : memref<1x1280xf32, #tpu.memory_space<vmem>>, vector<1x256xf32>
    %c0_2 = arith.constant 0 : index
    %c640 = arith.constant 640 : index
    %2 = vector.load %arg3[%c0_2, %c640] : memref<1x1280xf32, #tpu.memory_space<vmem>>, vector<1x256xf32>
    %c0_3 = arith.constant 0 : index
    %c896 = arith.constant 896 : index
    %3 = vector.load %arg3[%c0_3, %c896] : memref<1x1280xf32, #tpu.memory_space<vmem>>, vector<1x128xf32>
    %c0_4 = arith.constant 0 : index
    %c1024 = arith.constant 1024 : index
    %4 = vector.load %arg3[%c0_4, %c1024] : memref<1x1280xf32, #tpu.memory_space<vmem>>, vector<1x128xf32>
    %c0_5 = arith.constant 0 : index
    %c1152 = arith.constant 1152 : index
    %5 = vector.load %arg3[%c0_5, %c1152] : memref<1x1280xf32, #tpu.memory_space<vmem>>, vector<1x128xf32>
    %c0_6 = arith.constant 0 : index
    %c0_7 = arith.constant 0 : index
    %6 = vector.load %arg0[%c0_6, %c0_7] : memref<16x32xf32, #tpu.memory_space<vmem>>, vector<16x32xf32>
    %7 = arith.truncf %6 : vector<16x32xf32> to vector<16x32xbf16>
    %c0_8 = arith.constant 0 : index
    %c0_9 = arith.constant 0 : index
    %8 = vector.load %arg1[%c0_8, %c0_9] : memref<32x384xbf16, #tpu.memory_space<vmem>>, vector<32x384xbf16>
    %cst = arith.constant dense<0.000000e+00> : vector<16x384xf32>
    %9 = tpu.matmul %7, %8, %cst {dimension_numbers = #tpu.dot_dimension_numbers<[1], [0], [0], [1], [0, 0, 1, 1], [], []>} : vector<16x32xbf16>, vector<32x384xbf16>, vector<16x384xf32> -> vector<16x384xf32>
    %10 = vector.broadcast %0 : vector<1x384xf32> to vector<16x384xf32>
    %11 = arith.addf %9, %10 : vector<16x384xf32>
    %12 = vector.extract_strided_slice %11 {offsets = [0, 0], sizes = [16, 256], strides = [1, 1]} : vector<16x384xf32> to vector<16x256xf32>
    %13 = vector.extract_strided_slice %11 {offsets = [0, 256], sizes = [16, 128], strides = [1, 1]} : vector<16x384xf32> to vector<16x128xf32>
    %cst_10 = arith.constant 2.000000e-01 : f32
    %14 = vector.broadcast %cst_10 : f32 to vector<16x128xf32>
    %15 = arith.mulf %14, %13 : vector<16x128xf32>
    %16 = arith.maximumf %13, %15 : vector<16x128xf32>
    %cst_11 = arith.constant dense<0.000000e+00> : vector<256xf32>
    %17 = vector.multi_reduction <add>, %12, %cst_11 [0] : vector<16x256xf32> to vector<256xf32>
    %18 = vector.shape_cast %17 : vector<256xf32> to vector<1x256xf32>
    %cst_12 = arith.constant 1.600000e+01 : f32
    %19 = vector.broadcast %cst_12 : f32 to vector<1x256xf32>
    %20 = arith.divf %18, %19 : vector<1x256xf32>
    %21 = arith.mulf %12, %12 : vector<16x256xf32>
    %cst_13 = arith.constant dense<0.000000e+00> : vector<256xf32>
    %22 = vector.multi_reduction <add>, %21, %cst_13 [0] : vector<16x256xf32> to vector<256xf32>
    %23 = vector.shape_cast %22 : vector<256xf32> to vector<1x256xf32>
    %cst_14 = arith.constant 1.600000e+01 : f32
    %24 = vector.broadcast %cst_14 : f32 to vector<1x256xf32>
    %25 = arith.divf %23, %24 : vector<1x256xf32>
    %26 = arith.mulf %20, %20 : vector<1x256xf32>
    %27 = arith.subf %25, %26 : vector<1x256xf32>
    %cst_15 = arith.constant 0.000000e+00 : f32
    %28 = vector.broadcast %cst_15 : f32 to vector<1x256xf32>
    %29 = arith.maximumf %27, %28 : vector<1x256xf32>
    %cst_16 = arith.constant 9.99999974E-6 : f32
    %30 = vector.broadcast %cst_16 : f32 to vector<1x256xf32>
    %31 = arith.addf %29, %30 : vector<1x256xf32>
    %32 = math.rsqrt %31 : vector<1x256xf32>
    %33 = arith.mulf %1, %32 : vector<1x256xf32>
    %34 = arith.mulf %20, %33 : vector<1x256xf32>
    %35 = arith.subf %2, %34 : vector<1x256xf32>
    %36 = vector.broadcast %33 : vector<1x256xf32> to vector<16x256xf32>
    %37 = arith.mulf %12, %36 : vector<16x256xf32>
    %38 = vector.broadcast %35 : vector<1x256xf32> to vector<16x256xf32>
    %39 = arith.addf %37, %38 : vector<16x256xf32>
    %cst_17 = arith.constant 2.000000e-01 : f32
    %40 = vector.broadcast %cst_17 : f32 to vector<16x256xf32>
    %41 = arith.mulf %40, %39 : vector<16x256xf32>
    %42 = arith.maximumf %39, %41 : vector<16x256xf32>
    %43 = arith.truncf %42 : vector<16x256xf32> to vector<16x256xbf16>
    %c0_18 = arith.constant 0 : index
    %c0_19 = arith.constant 0 : index
    %44 = vector.load %arg2[%c0_18, %c0_19] : memref<256x128xbf16, #tpu.memory_space<vmem>>, vector<256x128xbf16>
    %cst_20 = arith.constant dense<0.000000e+00> : vector<16x128xf32>
    %45 = tpu.matmul %43, %44, %cst_20 {dimension_numbers = #tpu.dot_dimension_numbers<[1], [0], [0], [1], [0, 0, 1, 1], [], []>} : vector<16x256xbf16>, vector<256x128xbf16>, vector<16x128xf32> -> vector<16x128xf32>
    %46 = vector.broadcast %3 : vector<1x128xf32> to vector<16x128xf32>
    %47 = arith.addf %45, %46 : vector<16x128xf32>
    %cst_21 = arith.constant dense<0.000000e+00> : vector<128xf32>
    %48 = vector.multi_reduction <add>, %47, %cst_21 [0] : vector<16x128xf32> to vector<128xf32>
    %49 = vector.shape_cast %48 : vector<128xf32> to vector<1x128xf32>
    %cst_22 = arith.constant 1.600000e+01 : f32
    %50 = vector.broadcast %cst_22 : f32 to vector<1x128xf32>
    %51 = arith.divf %49, %50 : vector<1x128xf32>
    %52 = arith.mulf %47, %47 : vector<16x128xf32>
    %cst_23 = arith.constant dense<0.000000e+00> : vector<128xf32>
    %53 = vector.multi_reduction <add>, %52, %cst_23 [0] : vector<16x128xf32> to vector<128xf32>
    %54 = vector.shape_cast %53 : vector<128xf32> to vector<1x128xf32>
    %cst_24 = arith.constant 1.600000e+01 : f32
    %55 = vector.broadcast %cst_24 : f32 to vector<1x128xf32>
    %56 = arith.divf %54, %55 : vector<1x128xf32>
    %57 = arith.mulf %51, %51 : vector<1x128xf32>
    %58 = arith.subf %56, %57 : vector<1x128xf32>
    %cst_25 = arith.constant 0.000000e+00 : f32
    %59 = vector.broadcast %cst_25 : f32 to vector<1x128xf32>
    %60 = arith.maximumf %58, %59 : vector<1x128xf32>
    %cst_26 = arith.constant 9.99999974E-6 : f32
    %61 = vector.broadcast %cst_26 : f32 to vector<1x128xf32>
    %62 = arith.addf %60, %61 : vector<1x128xf32>
    %63 = math.rsqrt %62 : vector<1x128xf32>
    %64 = arith.mulf %4, %63 : vector<1x128xf32>
    %65 = arith.mulf %51, %64 : vector<1x128xf32>
    %66 = arith.subf %5, %65 : vector<1x128xf32>
    %67 = vector.broadcast %64 : vector<1x128xf32> to vector<16x128xf32>
    %68 = arith.mulf %47, %67 : vector<16x128xf32>
    %69 = vector.broadcast %66 : vector<1x128xf32> to vector<16x128xf32>
    %70 = arith.addf %68, %69 : vector<16x128xf32>
    %71 = arith.addf %16, %70 : vector<16x128xf32>
    %cst_27 = arith.constant 2.000000e-01 : f32
    %72 = vector.broadcast %cst_27 : f32 to vector<16x128xf32>
    %73 = arith.mulf %72, %71 : vector<16x128xf32>
    %74 = arith.maximumf %71, %73 : vector<16x128xf32>
    %75 = arith.truncf %74 : vector<16x128xf32> to vector<16x128xbf16>
    %c0_28 = arith.constant 0 : index
    %c0_29 = arith.constant 0 : index
    %76 = vector.load %arg4[%c0_28, %c0_29] : memref<16x128xbf16, #tpu.memory_space<vmem>>, vector<16x128xbf16>
    tpu.vector_store %arg4[%c0_28, %c0_29], %75 {strides = array<i32>} : memref<16x128xbf16, #tpu.memory_space<vmem>>, vector<16x128xbf16>,
    return
  }
}

</mosaic_0001>

<bundles_post_ra>
// kernel: tpu_custom_call.1
= control target key start
LH: loop header
LB: loop body
LE: loop exit
PB: predicated region body
PF: predicated region fallthrough
CT: control target
= control target key end

     0   :  { %9 = vsyncpa [#allocation3], 0  ;;  %s938_s0 = inlined_call_operand.hbm [shape: f32[16,32], index: 0, kind: input, shape index: {}]   ;;  %s939_s1 = inlined_call_operand.hbm [shape: bf16[32,384], index: 1, kind: input, shape index: {}]   ;;  %s940_s2 = inlined_call_operand.hbm [shape: bf16[256,128], index: 2, kind: input, shape index: {}]   ;;  %s941_s3 = inlined_call_operand.hbm [shape: f32[1,1280], index: 3, kind: input, shape index: {}]   ;;  %s942_s4 = inlined_call_operand.hbm [shape: bf16[16,128], index: 4, kind: output, shape index: {}]  }
   0x1   :  { %10 = vsyncpa [#allocation6], 0 }
   0x2   :  { %11 = vsyncpa [#allocation9], 0 }
   0x3   :  { %12 = vsyncpa [#allocation4], 0  ;;  %s828_s15 = smov [#allocation5]  }
   0x4   :  { %s30_s16 = sshll.u32 %s828_s15, 4  ;;  %s31_s16 = int_to_ptr.vmem [resolvable:$true] %s30_s16 }
   0x5   :  { %s728_s17 = scalar_lea.vmem %s31_s16, 768  ;;  %p733_p1 = scmp.lt.s32.totalorder %s31_s16, %s31_s16 }
   0x6   :  { %p729_p0 = scmp.ne.s32.totalorder %s31_s16, %s728_s17  ;;  %p734_p2 = scmp.lt.s32.totalorder %s728_s17, %s728_s17 }
   0x8   :  { %p735_p3 = por %p734_p2, %p733_p1 }
   0xa   :  { %p736_p4 = pnand %p735_p3, %p729_p0 }
   0xc   :  { %739 = shalt.err (!%p736_p4)
}
   0xd   :  { %s829_s18 = smov 192   ;;  %s830_s19 = smov 12  }
   0xe   :  { %36 = dma.hbm_to_vmem [thread:$0]  %s939_s1, 768, %s31_s16, [#allocation6], %s829_s18, %s829_s18, %s830_s19  }
   0xf   :  { %s831_s22 = smov [#allocation2]  }
  0x10   :  { %s18_s23 = sshll.u32 %s831_s22, 4  ;;  %s19_s23 = int_to_ptr.vmem [resolvable:$true] %s18_s23 }
  0x11   :  { %s748_s24 = scalar_lea.vmem %s19_s23, 256  ;;  %p753_p6 = scmp.lt.s32.totalorder %s19_s23, %s19_s23 }
  0x12   :  { %p749_p5 = scmp.ne.s32.totalorder %s19_s23, %s748_s24  ;;  %p754_p7 = scmp.lt.s32.totalorder %s748_s24, %s748_s24 }
  0x14   :  { %p755_p8 = por %p754_p7, %p753_p6 }
  0x16   :  { %p756_p9 = pnand %p755_p8, %p749_p5 }
  0x18   :  { %759 = shalt.err (!%p756_p9)
}
  0x19   :  { %s832_s25 = smov 128   ;;  %s833_s26 = smov 8  }
  0x1a   :  { %24 = dma.hbm_to_vmem [thread:$0]  %s938_s0, 256, %s19_s23, [#allocation3], %s832_s25, %s832_s25, %s833_s26  }
  0x1b   :  { %s834_s29 = smov [#allocation7]  }
  0x1c   :  { %s42_s30 = sshll.u32 %s834_s29, 4  ;;  %s43_s30 = int_to_ptr.vmem [resolvable:$true] %s42_s30 }
  0x1d   :  { %s768_s1 = scalar_lea.vmem %s43_s30, 2048  ;;  %p773_p11 = scmp.lt.s32.totalorder %s43_s30, %s43_s30 }
  0x1e   :  { %p769_p10 = scmp.ne.s32.totalorder %s43_s30, %s768_s1  ;;  %p774_p12 = scmp.lt.s32.totalorder %s768_s1, %s768_s1 }
  0x20   :  { %p775_p13 = por %p774_p12, %p773_p11 }
  0x22   :  { %p776_p0 = pnand %p775_p13, %p769_p10 }
  0x24   :  { %779 = shalt.err (!%p776_p0)
}
  0x25   :  { %s835_s5 = smov 64   ;;  %s836_s6 = smov 4  }
  0x26   :  { %48 = dma.hbm_to_vmem [thread:$0]  %s940_s2, 2048, %s43_s30, [#allocation6], %s835_s5, %s835_s5, %s836_s6  }
  0x27   :  { %s837_s0 = smov [#allocation8]  }
  0x28   :  { %s55_s9 = sshll.u32 %s837_s0, 4  ;;  %s56_s9 = int_to_ptr.vmem [resolvable:$true] %s55_s9 }
  0x29   :  { %s788_s10 = scalar_lea.vmem %s56_s9, 160  ;;  %p793_p2 = scmp.lt.s32.totalorder %s56_s9, %s56_s9 }
  0x2a   :  { %p789_p1 = scmp.ne.s32.totalorder %s56_s9, %s788_s10  ;;  %p794_p3 = scmp.lt.s32.totalorder %s788_s10, %s788_s10 }
  0x2c   :  { %p795_p4 = por %p794_p3, %p793_p2 }
  0x2e   :  { %p796_p5 = pnand %p795_p4, %p789_p1 }
  0x30   :  { %799 = shalt.err (!%p796_p5)
}
  0x31   :  { %58 = dma.hbm_to_vmem [thread:$0]  %s941_s3, 160, %s56_s9, [#allocation9]  }
  0x32   :  { %820 = dma.done.wait [#allocation3], 256  }
  0x33   :  { %821 = vsyncadd [#allocation3], 4294967040 }
  0x34   :  { %822 = dma.done.wait [#allocation6], 2816  }
  0x35   :  { %823 = vsyncadd [#allocation6], 4294964480 }
  0x36   :  { %824 = dma.done.wait [#allocation9], 160  }
  0x37   :  { %825 = vsyncadd [#allocation9], 4294967136  ;;  %v838_v0 = vmov 0   ;;  %v690_v1 = vld [vmem:[#allocation5 + $0x1c] ss:$12 sps:$4 sm:$0xff]   ;;  %v78_v5 = vld [vmem:[#allocation2] sm:$0xff]  ;;  %v90_v27 = vlaneseq }
  0x38   :  { %173 = vmatprep.mubr.bf16.mxu1 %v838_v0  ;;  %v692_v2 = vld [vmem:[#allocation5 + $0x18] ss:$12 sps:$4 sm:$0xff]   ;;  %153 = vmatprep.subr.bf16.mxu1 %v690_v1  ;;  %v695_v4 = vld [vmem:[#allocation5] ss:$12 sps:$4 sm:$0xff]   ;;  %vm137_vm0 = vcmask 261120   ;;  %v702_v14 = vld [vmem:[#allocation7 + $0x60] sm:$0xff]  }
  0x39   :  { %v693_v3 = vld [vmem:[#allocation5 + $0x4] ss:$12 sps:$4 sm:$0xff]   ;;  %154 = vmatpush1.bf16.msra.mxu1 %v692_v2  ;;  %v79_v6 = vld [vmem:[#allocation2 + $0x8] sm:$0xff]  ;;  %v696_v8 = vld [vmem:[#allocation7 + $0x78] sm:$0xff]   ;;  %v839_v25 = vmov 0.0   ;;  %vm840_vm1 = vmmov 0  }
  0x3a   :  { %155 = vmatprep.subr.bf16.mxu1 %v693_v3  ;;  %v80_v7 = vpack.c.bf16 %v79_v6, %v78_v5  ;;  %v697_v9 = vld [vmem:[#allocation7 + $0x38] sm:$0xff]   ;;  %645 = vmatprep.subr.bf16.mxu0 %v696_v8  ;;  %v698_v10 = vld [vmem:[#allocation7 + $0x70] sm:$0xff]   ;;  %v700_v12 = vld [vmem:[#allocation7 + $0x68] sm:$0xff]   ;;  %v885_v28 = vshrl.u32 %v90_v27, 7  ;;  %s842_s2 = smov [#allocation10]  }
  0x3b   :  { %646 = vmatpush3.bf16.msra.mxu0 %v697_v9  ;;  %v699_v11 = vld [vmem:[#allocation7 + $0x30] sm:$0xff]   ;;  %v701_v13 = vld [vmem:[#allocation7 + $0x28] sm:$0xff]   ;;  %v703_v15 = vld [vmem:[#allocation7 + $0x20] sm:$0xff]   ;;  %s594_s3 = sshll.u32 %s842_s2, 4  ;;  %s595_s3 = int_to_ptr.vmem [resolvable:$true] %s594_s3 }
  0x3c   :  { %647 = vmatprep.subr.bf16.mxu0 %v698_v10  ;;  %v704_v16 = vld [vmem:[#allocation7 + $0x58] sm:$0xff]   ;;  %v706_v18 = vld [vmem:[#allocation7 + $0x50] sm:$0xff]   ;;  %v708_v20 = vld [vmem:[#allocation7 + $0x48] sm:$0xff]   ;;  %v888_v29 = vsub.s32 0, %v885_v28  ;;  %v893_v31 = vsub.s32 1, %v885_v28  ;;  %s800_s13 = scalar_lea.vmem %s595_s3, 128  ;;  %p805_p7 = scmp.lt.s32.totalorder %s595_s3, %s595_s3 }
  0x3d   :  { %156 = vmatpush1.bf16.msra.mxu1 %v695_v4  ;;  %v705_v17 = vld [vmem:[#allocation7 + $0x18] sm:$0xff]   ;;  %v707_v19 = vld [vmem:[#allocation7 + $0x10] sm:$0xff]   ;;  %v709_v21 = vld [vmem:[#allocation7 + $0x8] sm:$0xff]   ;;  %p801_p6 = scmp.ne.s32.totalorder %s595_s3, %s800_s13  ;;  %p806_p8 = scmp.lt.s32.totalorder %s800_s13, %s800_s13 }
  0x3e   :  { %v710_v22 = vld [vmem:[#allocation7 + $0x40] sm:$0xff]   ;;  %v712_v24 = vld [vmem:[#allocation5 + $0x20] ss:$12 sps:$4 sm:$0xff]   ;;  %667 = vmatprep.subr.bf16.mxu1 %v839_v25 }
  0x3f   :  { %648 = vmatpush3.bf16.msra.mxu0 %v699_v11  ;;  %v711_v23 = vld [vmem:[#allocation7] sm:$0xff]   ;;  %p807_p9 = por %p806_p8, %p805_p7 }
  0x40   :  { %614 = vmatmul.mubr.msk.bf16.vlgmr.msra.gmra.mxu1 %vm137_vm0, %v80_v7  ;;  %649 = vmatprep.subr.bf16.mxu0 %v700_v12  ;;  %v713_v26 = vld [vmem:[#allocation5 + $0x8] ss:$12 sps:$4 sm:$0xff]   ;;  %v890_v30 = vld [vmem:[#allocation8] sm:$0x7] }
  0x41   :  { %671 = vmatprep.mubr.msk.bf16.mxu1 %vm840_vm1, %v839_v25  ;;  %668 = vmatpush3.bf16.msra.mxu1 %v712_v24  ;;  %v93_v32 = vrot.slane %v890_v30, %v888_v29  ;;  %v97_v34 = vrot.slane %v890_v30, %v893_v31  ;;  %p808_p10 = pnand %p807_p9, %p801_p6 }
  0x42   :  { %669 = vmatprep.subr.bf16.mxu1 %v839_v25 }
  0x43   :  { %650 = vmatpush3.bf16.msra.mxu0 %v701_v13 }
  0x44   :  { %651 = vmatprep.subr.bf16.mxu0 %v702_v14 }
  0x45   :  { %670 = vmatpush3.bf16.msra.mxu1 %v713_v26 }
  0x47   :  { %652 = vmatpush3.bf16.msra.mxu0 %v703_v15 }
  0x48   :  { %653 = vmatprep.subr.bf16.mxu0 %v704_v16  ;;  %672 = vmatmul.mubr.msk.bf16.vlgmr.msra.gmra.mxu1 %vm137_vm0, %v80_v7 }
  0x4b   :  { %654 = vmatpush3.bf16.msra.mxu0 %v705_v17 }
  0x4c   :  { %655 = vmatprep.subr.bf16.mxu0 %v706_v18 }
  0x4f   :  { %656 = vmatpush3.bf16.msra.mxu0 %v707_v19 }
  0x50   :  { %657 = vmatprep.subr.bf16.mxu0 %v708_v20 }
  0x53   :  { %658 = vmatpush3.bf16.msra.mxu0 %v709_v21 }
  0x54   :  { %659 = vmatprep.subr.bf16.mxu0 %v710_v22  ;;  %v841_v22 = vmov 1966171168  }
  0x57   :  { %660 = vmatpush3.bf16.msra.mxu0 %v711_v23  ;;  %v280_v23 = vunpack.c.l.s4 %v841_v22 }
  0x59   :  { %v281_v24 = vunpack.c.0.s8 %v280_v23 }
  0x5b   :  { %v284_v26 = vsub.s32 %v281_v24, %v885_v28 }
 0x100   :  { %v175_v33 = vpop.f32.mrf.mxu1 }
 0x101   :  { %v899_v36 = vadd.f32 %v175_v33, %v93_v32 }
 0x102   :  { %v177_v35 = vpop.f32.mrf.mxu1 }
 0x103   :  { %v901_v37 = vadd.f32 %v177_v35, %v97_v34  ;;  %v246_v41 = vmul.f32 %v899_v36, %v899_v36 }
 0x104   :  { %v179_v38 = vpop.f32.mrf.mxu1 }
 0x105   :  { %v903_v39 = vadd.f32 %v179_v38, %v93_v32  ;;  %v247_v45 = vmul.f32 %v901_v37, %v901_v37 }
 0x106   :  { %v181_v40 = vpop.f32.mrf.mxu1 }
 0x107   :  { %v229_v42 = vadd.f32 %v903_v39, %v899_v36  ;;  %v248_v43 = vmul.f32 %v903_v39, %v903_v39  ;;  %v911_v44 = vadd.f32 %v181_v40, %v97_v34  ;;  %v73_v34 = vld [vmem:[#allocation8 + $0x3] sm:$0x3] }
 0x109   :  { %v230_v46 = vrot.slane %v229_v42, 4  ;;  %v250_v47 = vadd.f32 %v248_v43, %v246_v41  ;;  %v236_v48 = vadd.f32 %v911_v44, %v901_v37  ;;  %v249_v49 = vmul.f32 %v911_v44, %v911_v44 }
 0x10b   :  { %v231_v50 = vadd.f32 %v230_v46, %v229_v42  ;;  %v251_v51 = vrot.slane %v250_v47, 4  ;;  %v237_v52 = vrot.slane %v236_v48, 4  ;;  %v257_v53 = vadd.f32 %v249_v49, %v247_v45 }
 0x10d   :  { %v232_v54 = vrot.slane %v231_v50, 2  ;;  %v252_v55 = vadd.f32 %v251_v51, %v250_v47  ;;  %v238_v56 = vadd.f32 %v237_v52, %v236_v48  ;;  %v258_v57 = vrot.slane %v257_v53, 4  ;;  %v74_v47 = vld [vmem:[#allocation8 + $0x5] sm:$0x3] }
 0x10f   :  { %v233_v58 = vadd.f32 %v232_v54, %v231_v50  ;;  %v253_v59 = vrot.slane %v252_v55, 2  ;;  %v239_v60 = vrot.slane %v238_v56, 2  ;;  %v259_v61 = vadd.f32 %v258_v57, %v257_v53 }
 0x111   :  { %v234_v62 = vrot.slane %v233_v58, 1  ;;  %v254_v63 = vadd.f32 %v253_v59, %v252_v55  ;;  %v240_v0 = vadd.f32 %v239_v60, %v238_v56  ;;  %v260_v1 = vrot.slane %v259_v61, 2 }
 0x113   :  { %v235_v2 = vadd.f32 %v234_v62, %v233_v58  ;;  %v255_v3 = vrot.slane %v254_v63, 1  ;;  %v241_v4 = vrot.slane %v240_v0, 1  ;;  %v261_v5 = vadd.f32 %v260_v1, %v259_v61 }
 0x115   :  { %v244_v6 = vmul.f32 0.0625, %v235_v2  ;;  %v256_v7 = vadd.f32 %v255_v3, %v254_v63  ;;  %v242_v8 = vadd.f32 %v241_v4, %v240_v0  ;;  %v262_v9 = vrot.slane %v261_v5, 1 }
 0x117   :  { %v264_v10 = vmul.f32 0.0625, %v256_v7  ;;  %v266_v11 = vmul.f32 %v244_v6, %v244_v6  ;;  %v245_v12 = vmul.f32 0.0625, %v242_v8  ;;  %v263_v13 = vadd.f32 %v262_v9, %v261_v5  ;;  %v616_v8 = vld [vmem:[#allocation8 + $0x7] ss:$0 sm:$0xff] }
 0x119   :  { %v268_v14 = vsub.f32 %v264_v10, %v266_v11  ;;  %v265_v15 = vmul.f32 0.0625, %v263_v13  ;;  %v267_v16 = vmul.f32 %v245_v12, %v245_v12 }
 0x11b   :  { %v270_v17 = vmax.f32 %v268_v14, 0.0  ;;  %v269_v18 = vsub.f32 %v265_v15, %v267_v16 }
 0x11d   :  { %v272_v19 = vadd.f32 1e-05, %v270_v17  ;;  %v271_v20 = vmax.f32 %v269_v18, 0.0 }
 0x11f   :  { %v273_v21 = vadd.f32 1e-05, %v271_v20  ;;  %714 = vrsqrt.f32 %v272_v19 }
 0x121   :  { %716 = vrsqrt.f32 %v273_v21 }
 0x12c   :  { %v715_v25 = vpop.eup %714 }
 0x12e   :  { %v717_v27 = vpop.eup %716 }
 0x12f   :  { %v278_v32 = vcombine.low %v715_v25, %v717_v27 }
 0x131   :  { %v285_v33 = vrot.slane %v278_v32, %v284_v26 }
 0x133   :  { %v292_v35 = vrot.slane %v285_v33, %v284_v26 }
 0x135   :  { %v294_v38 = vmul.f32 %v292_v35, %v73_v34 }
 0x137   :  { %v299_v40 = vrot.slane %v294_v38, %v888_v29  ;;  %v303_v41 = vrot.slane %v294_v38, %v893_v31 }
 0x139   :  { %v307_v42 = vmul.f32 %v303_v41, %v245_v12  ;;  %v306_v43 = vmul.f32 %v299_v40, %v244_v6  ;;  %v330_v50 = vmul.f32 %v303_v41, %v911_v44  ;;  %v328_v51 = vmul.f32 %v303_v41, %v901_v37 }
 0x13a   :  { %v327_v53 = vmul.f32 %v299_v40, %v899_v36  ;;  %v329_v54 = vmul.f32 %v299_v40, %v903_v39  ;;  %v218_v36 = vpop.f32.mrf.mxu1 }
 0x13b   :  { %v310_v45 = vcombine.low %v306_v43, %v307_v42  ;;  %v100_v43 = vsub.s32 2, %v885_v28 }
 0x13c   :  { %v673_v39 = vpop.f32.mrf.mxu1 }
 0x13d   :  { %v317_v46 = vrot.slane %v310_v45, %v284_v26  ;;  %v101_v45 = vrot.slane %v890_v30, %v100_v43 }
 0x13e   :  { %v221_v3 = vpop.f32.mrf.mxu1 }
 0x13f   :  { %v324_v48 = vrot.slane %v317_v46, %v284_v26  ;;  %v76_v46 = vld [vmem:[#allocation8 + $0x8] sm:$0x1] }
 0x140   :  { %v674_v4 = vpop.f32.mrf.mxu1 }
 0x141   :  { %v326_v49 = vsub.f32 %v74_v47, %v324_v48 }
 0x143   :  { %v339_v52 = vrot.slane %v326_v49, %v893_v31  ;;  %v335_v55 = vrot.slane %v326_v49, %v888_v29  ;;  %v219_v49 = vadd.f32 %v218_v36, %v101_v45 }
 0x145   :  { %v343_v56 = vadd.f32 %v339_v52, %v328_v51  ;;  %v345_v57 = vadd.f32 %v339_v52, %v330_v50  ;;  %v342_v58 = vadd.f32 %v335_v55, %v327_v53  ;;  %v344_v59 = vadd.f32 %v335_v55, %v329_v54  ;;  %v77_v51 = vld [vmem:[#allocation8 + $0x9] sm:$0x1] }
 0x146   :  { %v222_v50 = vadd.f32 %v221_v3, %v101_v45  ;;  %v225_v54 = vmul.f32 0.2, %v219_v49 }
 0x147   :  { %v347_v60 = vmul.f32 0.2, %v343_v56  ;;  %v349_v61 = vmul.f32 0.2, %v345_v57  ;;  %v346_v62 = vmul.f32 0.2, %v342_v58 }
 0x148   :  { %v348_v63 = vmul.f32 0.2, %v344_v59 }
 0x149   :  { %v351_v0 = vmax.f32 %v343_v56, %v347_v60  ;;  %v353_v44 = vmax.f32 %v345_v57, %v349_v61  ;;  %v350_v1 = vmax.f32 %v342_v58, %v346_v62  ;;  %v226_v56 = vmul.f32 0.2, %v222_v50 }
 0x14a   :  { %v352_v37 = vmax.f32 %v344_v59, %v348_v63  ;;  %v227_v60 = vmax.f32 %v219_v49, %v225_v54 }
 0x14b   :  { %v355_v2 = vpack.c.bf16 %v353_v44, %v351_v0  ;;  %v228_v61 = vmax.f32 %v222_v50, %v226_v56 }
 0x14c   :  { %v354_v31 = vpack.c.bf16 %v352_v37, %v350_v1 }
 0x14d   :  { %522 = vmatprep.mubr.bf16.mxu0 %v355_v2 }
 0x14e   :  { %523 = vmatmul.mubr.bf16.vlgmr.msra.gmra.mxu0 %v354_v31 }
 0x20e   :  { %v661_v5 = vpop.f32.mrf.mxu0 }
 0x210   :  { %v662_v6 = vpop.f32.mrf.mxu0 }
 0x211   :  { %v663_v7 = vadd.f32 %v662_v6, %v661_v5 }
 0x212   :  { %v664_v9 = vpop.f32.mrf.mxu0 }
 0x213   :  { %v525_v11 = vadd.f32 %v663_v7, %v616_v8 }
 0x214   :  { %v665_v10 = vpop.f32.mrf.mxu0 }
 0x215   :  { %v666_v12 = vadd.f32 %v665_v10, %v664_v9  ;;  %v539_v14 = vmul.f32 %v525_v11, %v525_v11 }
 0x217   :  { %v528_v13 = vadd.f32 %v666_v12, %v616_v8 }
 0x219   :  { %v531_v15 = vadd.f32 %v528_v13, %v525_v11  ;;  %v540_v16 = vmul.f32 %v528_v13, %v528_v13 }
 0x21b   :  { %v532_v17 = vrot.slane %v531_v15, 4  ;;  %v541_v18 = vadd.f32 %v540_v16, %v539_v14 }
 0x21d   :  { %v533_v19 = vadd.f32 %v532_v17, %v531_v15  ;;  %v542_v20 = vrot.slane %v541_v18, 4 }
 0x21f   :  { %v534_v21 = vrot.slane %v533_v19, 2  ;;  %v543_v22 = vadd.f32 %v542_v20, %v541_v18 }
 0x221   :  { %v535_v23 = vadd.f32 %v534_v21, %v533_v19  ;;  %v544_v24 = vrot.slane %v543_v22, 2 }
 0x223   :  { %v536_v25 = vrot.slane %v535_v23, 1  ;;  %v545_v26 = vadd.f32 %v544_v24, %v543_v22 }
 0x225   :  { %v537_v27 = vadd.f32 %v536_v25, %v535_v23  ;;  %v546_v32 = vrot.slane %v545_v26, 1 }
 0x227   :  { %v538_v33 = vmul.f32 0.0625, %v537_v27  ;;  %v547_v34 = vadd.f32 %v546_v32, %v545_v26 }
 0x229   :  { %v548_v35 = vmul.f32 0.0625, %v547_v34  ;;  %v549_v38 = vmul.f32 %v538_v33, %v538_v33 }
 0x22b   :  { %v550_v40 = vsub.f32 %v548_v35, %v549_v38 }
 0x22d   :  { %v551_v41 = vmax.f32 %v550_v40, 0.0 }
 0x22f   :  { %v552_v42 = vadd.f32 1e-05, %v551_v41 }
 0x231   :  { %718 = vrsqrt.f32 %v552_v42 }
 0x23e   :  { %v719_v47 = vpop.eup %718 }
 0x23f   :  { %v554_v48 = vmul.f32 %v719_v47, %v76_v46 }
 0x241   :  { %v561_v52 = vrot.slane %v554_v48, %v888_v29  ;;  %v555_v53 = vmul.f32 %v554_v48, %v538_v33 }
 0x243   :  { %v556_v55 = vsub.f32 %v77_v51, %v555_v53  ;;  %v564_v57 = vmul.f32 %v561_v52, %v528_v13  ;;  %v563_v58 = vmul.f32 %v561_v52, %v525_v11 }
 0x245   :  { %v569_v59 = vrot.slane %v556_v55, %v888_v29 }
 0x247   :  { %v571_v28 = vadd.f32 %v569_v59, %v563_v58  ;;  %v572_v30 = vadd.f32 %v569_v59, %v564_v57 }
 0x249   :  { %v573_v62 = vadd.f32 %v571_v28, %v227_v60  ;;  %v574_v63 = vadd.f32 %v572_v30, %v228_v61 }
 0x24b   :  { %v575_v0 = vmul.f32 0.2, %v573_v62  ;;  %v576_v44 = vmul.f32 0.2, %v574_v63 }
 0x24d   :  { %v577_v1 = vmax.f32 %v573_v62, %v575_v0  ;;  %v578_v37 = vmax.f32 %v574_v63, %v576_v44 }
 0x24f   :  { %v640_v2 = vpack.c.bf16 %v578_v37, %v577_v1 }
 0x251   :  { %641 = vst [vmem:[#allocation10] sm:$0xff] %v640_v2  }
 0x252   :  { %811 = shalt.err (!%p808_p10)
}
 0x253   :  { %600 = dma.vmem_to_hbm [thread:$0]  %s595_s3, 128, %s942_s4, [#allocation4], %s835_s5, %s835_s5, %s836_s6  }
 0x254   :  { %826 = dma.done.wait [#allocation4], 128  }
 0x255   :  { %827 = vsyncadd [#allocation4], 4294967168 }
 0x256   :  { %604 = vsyncpa [#allocation3], 1 }
 0x257   :  { %605 = vsyncpa [#allocation6], 1 }
 0x258   :  { %606 = vsyncpa [#allocation9], 1 }
 0x259   :  { %607 = vsyncpa [#allocation4], 1 }

</bundles_post_ra>
